<compile_context>
chip_gen: v7x
topology: tpu7x:2x2x1
jax: 0.10.0
libtpu: 0.0.40
codegen_flags: <defaults>
</compile_context>

<pallas_src>
import jax
import jax.numpy as jnp
from jax.experimental import pallas as pl
from jax.experimental.pallas import tpu as pltpu

KERNEL_SIZE = 5
DILATION = 2
NEG_SLOPE = 0.01

# Batch-tile cap (rows). Per-tile VMEM (f32, double-buffered):
#   x   : TILE_N x L (lane-padded)  ~4 MiB @ 4096 rows, L=136  (x2 buffers)
#   out : TILE_N x n_classes (lane-padded to 128) ~2 MiB       (x2 buffers)
# ~12 MiB of pipeline buffers + compute temporaries stays inside the 32 MiB limit.
MAX_TILE_N = 4096


def _leaky_relu(x):
    return jnp.where(x > 0, x, NEG_SLOPE * x)


def _round_up(x, m):
    return (x + m - 1) // m * m


def _cdiv(a, b):
    return -(-a // b)


def offf_kernel(x_ref, wconv_ref, bconv_ref, w3_ref, b3_ref, w4_ref, b4_ref, o_ref):
    # x_ref: (TILE_N, L) VMEM tile; conv weight/bias live in SMEM (scalar path).
    _, length = x_ref.shape
    l_out = length - DILATION * (KERNEL_SIZE - 1)          # stride 1, no padding

    x = x_ref[...]

    # Dilated 1-D convolution (1 in-channel, 1 out-channel): scalar-weighted shifted
    # slices on the VPU; accumulator starts from tap 0 (lane-aligned, no shift).
    acc = wconv_ref[0] * x[:, 0:l_out]
    for k in range(1, KERNEL_SIZE):
        off = k * DILATION
        acc = acc + wconv_ref[k] * x[:, off:off + l_out]
    acc = acc + bconv_ref[0]

    y = _leaky_relu(acc)                                   # act2

    # layer3: Linear(l_out, 2) on the MXU (w3 passed pre-transposed as (l_out, 2)).
    h = jnp.dot(y, w3_ref[...], preferred_element_type=jnp.float32) + b3_ref[...]
    h = _leaky_relu(h)                                     # act3
    # TODO(synk): dropout implemented as identity (inference / eval mode).

    # layer4: Linear(2, n_classes) as two VPU broadcast FMAs (K=2 matmul is degenerate
    # on the MXU).  w4 passed pre-transposed as (2, n_classes).
    out = (h[:, 0:1] * w4_ref[0:1, :]
           + h[:, 1:2] * w4_ref[1:2, :]
           + b4_ref[...])
    o_ref[...] = out.astype(o_ref.dtype)


@jax.jit
def output_feed_forward(x_ncl, wconv, bconv, w3, b3, w4, b4):
    # x_ncl: (N, 1, L) as in PyTorch.  Squeeze channel dim (glue, plain JAX).
    n, c, length = x_ncl.shape
    assert c == 1
    n_classes = w4.shape[0]
    l_out = length - DILATION * (KERNEL_SIZE - 1)

    x2d = x_ncl.reshape(n, length).astype(jnp.float32)

    # Balanced batch tiling: round N up to 8 sublanes, pick the smallest grid whose
    # tiles stay under MAX_TILE_N, then size tiles to cover N with minimal padding.
    n8 = _round_up(max(n, 8), 8)
    grid_n = _cdiv(n8, MAX_TILE_N)
    tile_n = _round_up(_cdiv(n8, grid_n), 8)
    n_pad = tile_n * grid_n
    if n_pad != n:
        x2d = jnp.pad(x2d, ((0, n_pad - n), (0, 0)))

    wconv_s = wconv.reshape(KERNEL_SIZE).astype(jnp.float32)   # (5,)  SMEM, 1-D
    bconv_s = bconv.reshape(1).astype(jnp.float32)             # (1,)  SMEM
    w3_t = jnp.transpose(w3).astype(jnp.float32)               # (l_out, 2) VMEM
    b3_r = b3.reshape(1, 2).astype(jnp.float32)
    w4_t = jnp.transpose(w4).astype(jnp.float32)               # (2, n_classes) VMEM
    b4_r = b4.reshape(1, n_classes).astype(jnp.float32)

    flops = n_pad * (KERNEL_SIZE * l_out * 2 + l_out * 2 * 2 + 2 * n_classes * 2)
    bytes_accessed = 4 * (n_pad * length + n_pad * n_classes
                          + KERNEL_SIZE + 1 + l_out * 2 + 2
                          + 2 * n_classes + n_classes)

    out_padded = pl.pallas_call(
        offf_kernel,
        out_shape=jax.ShapeDtypeStruct((n_pad, n_classes), jnp.float32),
        grid_spec=pltpu.PrefetchScalarGridSpec(
            num_scalar_prefetch=0,
            grid=(grid_n,),
            in_specs=[
                pl.BlockSpec((tile_n, length), lambda i: (i, 0)),    # x batch tile
                pl.BlockSpec(memory_space=pltpu.MemorySpace.SMEM),   # conv weight
                pl.BlockSpec(memory_space=pltpu.MemorySpace.SMEM),   # conv bias
                pl.BlockSpec(memory_space=pltpu.MemorySpace.VMEM),   # w3^T
                pl.BlockSpec(memory_space=pltpu.MemorySpace.VMEM),   # b3
                pl.BlockSpec(memory_space=pltpu.MemorySpace.VMEM),   # w4^T
                pl.BlockSpec(memory_space=pltpu.MemorySpace.VMEM),   # b4
            ],
            out_specs=pl.BlockSpec((tile_n, n_classes), lambda i: (i, 0)),
        ),
        compiler_params=pltpu.CompilerParams(
            dimension_semantics=("parallel",),       # shard grid across TCs on v7x
            vmem_limit_bytes=32 * 1024 * 1024,       # explicit, safe on v5e/v6e/v7x
        ),
        cost_estimate=pl.CostEstimate(
            flops=flops, transcendentals=0, bytes_accessed=bytes_accessed),
    )(x2d, wconv_s, bconv_s, w3_t, b3_r, w4_t, b4_r)

    return out_padded[:n]


def reference_forward(x_ncl, wconv, bconv, w3, b3, w4, b4):
    """Pure-JAX reference mirroring the PyTorch forward (eval mode)."""
    n, _, length = x_ncl.shape
    l_out = length - DILATION * (KERNEL_SIZE - 1)
    x = x_ncl.reshape(n, length).astype(jnp.float32)
    acc = jnp.zeros((n, l_out), jnp.float32)
    for k in range(KERNEL_SIZE):
        off = k * DILATION
        acc = acc + wconv[k] * x[:, off:off + l_out]
    acc = acc + bconv[0]
    y = jnp.where(acc > 0, acc, NEG_SLOPE * acc)
    h = y @ w3.T + b3
    h = jnp.where(h > 0, h, NEG_SLOPE * h)
    return h @ w4.T + b4


if __name__ == "__main__":
    # Small shapes consistent with the module:
    #   input_dim = 136  ->  layer2_dim (conv output length) = 128
    N = 8
    INPUT_DIM = 136
    N_CLASSES = 4

    key = jax.random.PRNGKey(0)
    kx, kwc, kbc, kw3, kb3, kw4, kb4 = jax.random.split(key, 7)

    x = jax.random.normal(kx, (N, 1, INPUT_DIM), dtype=jnp.float32)

    l_out = INPUT_DIM - DILATION * (KERNEL_SIZE - 1)                    # 128
    wconv = jax.random.normal(kwc, (KERNEL_SIZE,), jnp.float32) * 0.2   # Conv1d weight (1,1,5) flattened
    bconv = jax.random.normal(kbc, (1,), jnp.float32) * 0.1             # Conv1d bias
    w3 = jax.random.normal(kw3, (2, l_out), jnp.float32) * 0.05         # Linear(l_out, 2) weight
    b3 = jax.random.normal(kb3, (2,), jnp.float32) * 0.1
    w4 = jax.random.normal(kw4, (N_CLASSES, 2), jnp.float32) * 0.3      # Linear(2, n_classes) weight
    b4 = jax.random.normal(kb4, (N_CLASSES,), jnp.float32) * 0.1

    out = output_feed_forward(x, wconv, bconv, w3, b3, w4, b4)
    out = jax.block_until_ready(out)

    ref = reference_forward(x, wconv, bconv, w3, b3, w4, b4)
    assert out.shape == (N, N_CLASSES)
    assert jnp.allclose(out, ref, atol=1e-4, rtol=1e-4), (out, ref)

    print("KERNEL_OK")
</pallas_src>

<mosaic_0001>
module attributes {stable_mosaic.version = 11 : i64} {
  func.func @offf_kernel(%arg0: i32, %arg1: memref<8x136xf32, #tpu.memory_space<vmem>>, %arg2: memref<5xf32, #tpu.memory_space<smem>>, %arg3: memref<1xf32, #tpu.memory_space<smem>>, %arg4: memref<128x2xf32, #tpu.memory_space<vmem>>, %arg5: memref<1x2xf32, #tpu.memory_space<vmem>>, %arg6: memref<2x4xf32, #tpu.memory_space<vmem>>, %arg7: memref<1x4xf32, #tpu.memory_space<vmem>>, %arg8: memref<8x4xf32, #tpu.memory_space<vmem>>) attributes {dimension_semantics = [#tpu.dimension_semantics<parallel>], iteration_bounds = array<i64: 1>, scalar_prefetch = 0 : i64, scratch_operands = 0 : i64, tpu.core_type = #tpu.core_type<tc>, window_params = [{transform_indices = @transform_0, window_bounds = array<i64: 8, 136>}, {transform_indices = @transform_1, window_bounds = array<i64: 5>}, {transform_indices = @transform_2, window_bounds = array<i64: 1>}, {pipeline_mode = #tpu.pipeline_mode<synchronous>, transform_indices = @transform_3, window_bounds = array<i64: 128, 2>}, {pipeline_mode = #tpu.pipeline_mode<synchronous>, transform_indices = @transform_4, window_bounds = array<i64: 1, 2>}, {pipeline_mode = #tpu.pipeline_mode<synchronous>, transform_indices = @transform_5, window_bounds = array<i64: 2, 4>}, {pipeline_mode = #tpu.pipeline_mode<synchronous>, transform_indices = @transform_6, window_bounds = array<i64: 1, 4>}, {transform_indices = @transform_7, window_bounds = array<i64: 8, 4>}]} {
    %c0 = arith.constant 0 : index
    %c0_0 = arith.constant 0 : index
    %0 = vector.load %arg1[%c0, %c0_0] : memref<8x136xf32, #tpu.memory_space<vmem>>, vector<8x136xf32>
    %c0_1 = arith.constant 0 : index
    %1 = memref.load %arg2[%c0_1] : memref<5xf32, #tpu.memory_space<smem>>
    %2 = vector.extract_strided_slice %0 {offsets = [0, 0], sizes = [8, 128], strides = [1, 1]} : vector<8x136xf32> to vector<8x128xf32>
    %3 = vector.broadcast %1 : f32 to vector<8x128xf32>
    %4 = arith.mulf %3, %2 : vector<8x128xf32>
    %c1 = arith.constant 1 : index
    %5 = memref.load %arg2[%c1] : memref<5xf32, #tpu.memory_space<smem>>
    %6 = vector.extract_strided_slice %0 {offsets = [0, 2], sizes = [8, 128], strides = [1, 1]} : vector<8x136xf32> to vector<8x128xf32>
    %7 = vector.broadcast %5 : f32 to vector<8x128xf32>
    %8 = arith.mulf %7, %6 : vector<8x128xf32>
    %9 = arith.addf %4, %8 : vector<8x128xf32>
    %c2 = arith.constant 2 : index
    %10 = memref.load %arg2[%c2] : memref<5xf32, #tpu.memory_space<smem>>
    %11 = vector.extract_strided_slice %0 {offsets = [0, 4], sizes = [8, 128], strides = [1, 1]} : vector<8x136xf32> to vector<8x128xf32>
    %12 = vector.broadcast %10 : f32 to vector<8x128xf32>
    %13 = arith.mulf %12, %11 : vector<8x128xf32>
    %14 = arith.addf %9, %13 : vector<8x128xf32>
    %c3 = arith.constant 3 : index
    %15 = memref.load %arg2[%c3] : memref<5xf32, #tpu.memory_space<smem>>
    %16 = vector.extract_strided_slice %0 {offsets = [0, 6], sizes = [8, 128], strides = [1, 1]} : vector<8x136xf32> to vector<8x128xf32>
    %17 = vector.broadcast %15 : f32 to vector<8x128xf32>
    %18 = arith.mulf %17, %16 : vector<8x128xf32>
    %19 = arith.addf %14, %18 : vector<8x128xf32>
    %c4 = arith.constant 4 : index
    %20 = memref.load %arg2[%c4] : memref<5xf32, #tpu.memory_space<smem>>
    %21 = vector.extract_strided_slice %0 {offsets = [0, 8], sizes = [8, 128], strides = [1, 1]} : vector<8x136xf32> to vector<8x128xf32>
    %22 = vector.broadcast %20 : f32 to vector<8x128xf32>
    %23 = arith.mulf %22, %21 : vector<8x128xf32>
    %24 = arith.addf %19, %23 : vector<8x128xf32>
    %c0_2 = arith.constant 0 : index
    %25 = memref.load %arg3[%c0_2] : memref<1xf32, #tpu.memory_space<smem>>
    %26 = vector.broadcast %25 : f32 to vector<8x128xf32>
    %27 = arith.addf %24, %26 : vector<8x128xf32>
    %cst = arith.constant 0.000000e+00 : f32
    %28 = vector.broadcast %cst : f32 to vector<8x128xf32>
    %29 = arith.cmpf ogt, %27, %28 : vector<8x128xf32>
    %cst_3 = arith.constant 0.00999999977 : f32
    %30 = vector.broadcast %cst_3 : f32 to vector<8x128xf32>
    %31 = arith.mulf %30, %27 : vector<8x128xf32>
    %32 = arith.select %29, %27, %31 : vector<8x128xi1>, vector<8x128xf32>
    %c0_4 = arith.constant 0 : index
    %c0_5 = arith.constant 0 : index
    %33 = vector.load %arg4[%c0_4, %c0_5] : memref<128x2xf32, #tpu.memory_space<vmem>>, vector<128x2xf32>
    %cst_6 = arith.constant dense<0.000000e+00> : vector<8x2xf32>
    %34 = tpu.matmul %32, %33, %cst_6 {dimension_numbers = #tpu.dot_dimension_numbers<[1], [0], [0], [1], [0, 0, 1, 1], [], []>} : vector<8x128xf32>, vector<128x2xf32>, vector<8x2xf32> -> vector<8x2xf32>
    %c0_7 = arith.constant 0 : index
    %c0_8 = arith.constant 0 : index
    %35 = vector.load %arg5[%c0_7, %c0_8] : memref<1x2xf32, #tpu.memory_space<vmem>>, vector<1x2xf32>
    %36 = vector.broadcast %35 : vector<1x2xf32> to vector<8x2xf32>
    %37 = arith.addf %34, %36 : vector<8x2xf32>
    %cst_9 = arith.constant 0.000000e+00 : f32
    %38 = vector.broadcast %cst_9 : f32 to vector<8x2xf32>
    %39 = arith.cmpf ogt, %37, %38 : vector<8x2xf32>
    %cst_10 = arith.constant 0.00999999977 : f32
    %40 = vector.broadcast %cst_10 : f32 to vector<8x2xf32>
    %41 = arith.mulf %40, %37 : vector<8x2xf32>
    %42 = arith.select %39, %37, %41 : vector<8x2xi1>, vector<8x2xf32>
    %43 = vector.extract_strided_slice %42 {offsets = [0, 0], sizes = [8, 1], strides = [1, 1]} : vector<8x2xf32> to vector<8x1xf32>
    %c0_11 = arith.constant 0 : index
    %c0_12 = arith.constant 0 : index
    %44 = vector.load %arg6[%c0_11, %c0_12] : memref<2x4xf32, #tpu.memory_space<vmem>>, vector<1x4xf32>
    %45 = vector.broadcast %43 : vector<8x1xf32> to vector<8x4xf32>
    %46 = vector.broadcast %44 : vector<1x4xf32> to vector<8x4xf32>
    %47 = arith.mulf %45, %46 : vector<8x4xf32>
    %48 = vector.extract_strided_slice %42 {offsets = [0, 1], sizes = [8, 1], strides = [1, 1]} : vector<8x2xf32> to vector<8x1xf32>
    %c1_13 = arith.constant 1 : index
    %c0_14 = arith.constant 0 : index
    %49 = vector.load %arg6[%c1_13, %c0_14] : memref<2x4xf32, #tpu.memory_space<vmem>>, vector<1x4xf32>
    %50 = vector.broadcast %48 : vector<8x1xf32> to vector<8x4xf32>
    %51 = vector.broadcast %49 : vector<1x4xf32> to vector<8x4xf32>
    %52 = arith.mulf %50, %51 : vector<8x4xf32>
    %53 = arith.addf %47, %52 : vector<8x4xf32>
    %c0_15 = arith.constant 0 : index
    %c0_16 = arith.constant 0 : index
    %54 = vector.load %arg7[%c0_15, %c0_16] : memref<1x4xf32, #tpu.memory_space<vmem>>, vector<1x4xf32>
    %55 = vector.broadcast %54 : vector<1x4xf32> to vector<8x4xf32>
    %56 = arith.addf %53, %55 : vector<8x4xf32>
    %c0_17 = arith.constant 0 : index
    %c0_18 = arith.constant 0 : index
    %57 = vector.load %arg8[%c0_17, %c0_18] : memref<8x4xf32, #tpu.memory_space<vmem>>, vector<8x4xf32>
    tpu.vector_store %arg8[%c0_17, %c0_18], %56 {strides = array<i32>} : memref<8x4xf32, #tpu.memory_space<vmem>>, vector<8x4xf32>,
    return
  }
  func.func @transform_0(%arg0: i32) -> (i32, i32) {
    %c0_i32 = arith.constant 0 : i32
    %c0_i32_0 = arith.constant 0 : i32
    return %arg0, %c0_i32 : i32, i32
  }
  func.func @transform_1(%arg0: i32) -> i32 {
    %c0_i32 = arith.constant 0 : i32
    %c0_i32_0 = arith.constant 0 : i32
    return %c0_i32 : i32
  }
  func.func @transform_2(%arg0: i32) -> i32 {
    %c0_i32 = arith.constant 0 : i32
    %c0_i32_0 = arith.constant 0 : i32
    return %c0_i32 : i32
  }
  func.func @transform_3(%arg0: i32) -> (i32, i32) {
    %c0_i32 = arith.constant 0 : i32
    %c0_i32_0 = arith.constant 0 : i32
    %c0_i32_1 = arith.constant 0 : i32
    return %c0_i32, %c0_i32_0 : i32, i32
  }
  func.func @transform_4(%arg0: i32) -> (i32, i32) {
    %c0_i32 = arith.constant 0 : i32
    %c0_i32_0 = arith.constant 0 : i32
    %c0_i32_1 = arith.constant 0 : i32
    return %c0_i32, %c0_i32_0 : i32, i32
  }
  func.func @transform_5(%arg0: i32) -> (i32, i32) {
    %c0_i32 = arith.constant 0 : i32
    %c0_i32_0 = arith.constant 0 : i32
    %c0_i32_1 = arith.constant 0 : i32
    return %c0_i32, %c0_i32_0 : i32, i32
  }
  func.func @transform_6(%arg0: i32) -> (i32, i32) {
    %c0_i32 = arith.constant 0 : i32
    %c0_i32_0 = arith.constant 0 : i32
    %c0_i32_1 = arith.constant 0 : i32
    return %c0_i32, %c0_i32_0 : i32, i32
  }
  func.func @transform_7(%arg0: i32) -> (i32, i32) {
    %c0_i32 = arith.constant 0 : i32
    %c0_i32_0 = arith.constant 0 : i32
    return %arg0, %c0_i32 : i32, i32
  }
}

</mosaic_0001>

<bundles_post_ra>
// kernel: output_feed_forward.1
= control target key start
LH: loop header
LB: loop body
LE: loop exit
PB: predicated region body
PF: predicated region fallthrough
CT: control target
= control target key end

     0   :  { %13 = vsyncpa [#allocation4], 0  ;;  %s497_s0 = inlined_call_operand.vmem [shape: f32[8,136], index: 0, kind: input, shape index: {}]   ;;  %s498_s1 = inlined_call_operand.vmem [shape: f32[5], index: 1, kind: input, shape index: {}]   ;;  %s499_s2 = inlined_call_operand.<no memory space> [shape: f32[1], index: 2, kind: input, shape index: {}]   ;;  %s500_s3 = inlined_call_operand.vmem [shape: f32[128,2], index: 3, kind: input, shape index: {}]   ;;  %s501_s4 = inlined_call_operand.vmem [shape: f32[1,2], index: 4, kind: input, shape index: {}]   ;;  %s502_s5 = inlined_call_operand.vmem [shape: f32[2,4], index: 5, kind: input, shape index: {}]   ;;  %s503_s6 = inlined_call_operand.vmem [shape: f32[1,4], index: 6, kind: input, shape index: {}]   ;;  %s504_s7 = inlined_call_operand.vmem [shape: f32[8,4], index: 7, kind: output, shape index: {}]  }
   0x1   :  { %s22_s26 = sshll.u32 %s498_s1, 4  ;;  %s23_s26 = int_to_ptr.vmem [resolvable:$true] %s22_s26 }
   0x2   :  { %s337_s27 = scalar_lea.vmem %s23_s26, 16  ;;  %p342_p1 = scmp.lt.s32.totalorder %s23_s26, %s23_s26 }
   0x3   :  { %p338_p0 = scmp.ne.s32.totalorder %s23_s26, %s337_s27  ;;  %p343_p2 = scmp.lt.s32.totalorder %s337_s27, %s337_s27 }
   0x5   :  { %p344_p3 = por %p343_p2, %p342_p1 }
   0x7   :  { %p345_p4 = pnand %p344_p3, %p338_p0 }
   0x9   :  { %348 = shalt.err (!%p345_p4)
}
   0xa   :  { %s351_s28 = smov [#allocation3]  }
   0xb   :  { %25 = dma.vmem_to_smem %s23_s26, 16, %s351_s28, [#allocation4]  }
   0xc   :  { %349 = dma.done.wait [#allocation4], 16  }
   0xd   :  { %350 = vsyncadd [#allocation4], 4294967280 }
   0xe   :  { %39 = sfence }
   0xf   :  { %s241_s29 = sld [smem:[#allocation3 + $0x2]]  ;;  %s240_s30 = sld [smem:[#allocation3 + $0x1]]  ;;  %v352_v0 = vmov 0.0|0.0   ;;  %v107_v1 = vld [vmem:[%s500_s3] sm:$0xff]  ;;  %v108_v2 = vld [vmem:[%s500_s3 + $0x8] sm:$0xff]  ;;  %v109_v3 = vld [vmem:[%s500_s3 + $0x10] sm:$0xff]  ;;  %v102_v56 = vstv %s499_s2 }
  0x10   :  { %300 = vmatprep.subr.bf16.mxu0 %v352_v0  ;;  %s414_s13 = sld [smem:[#allocation3 + $0x3]]  ;;  %v301_v4 = vpack.c.bf16 %v108_v2, %v107_v1  ;;  %v110_v5 = vld [vmem:[%s500_s3 + $0x18] sm:$0xff]  ;;  %v422_v6 = vld [vmem:[%s497_s0] sm:$0xff]  ;;  %v112_v9 = vld [vmem:[%s500_s3 + $0x28] sm:$0xff]  ;;  %s434_s24 = sld [smem:[#allocation3 + $0x4]]  ;;  %vm355_vm0 = vmmov 0  }
  0x11   :  { %v304_v7 = vpack.c.bf16 %v110_v5, %v109_v3  ;;  %v111_v8 = vld [vmem:[%s500_s3 + $0x20] sm:$0xff]  ;;  %v41_v10 = vld [vmem:[%s497_s0 + $0x8] sm:$0xff]  ;;  %s353_s25 = smov 124   ;;  %v113_v17 = vld [vmem:[%s500_s3 + $0x30] sm:$0xff]  ;;  %v356_v27 = vmov 0.0   ;;  %s357_s10 = smov 122  }
  0x12   :  { %302 = vmatpush3.bf16.msra.mxu0 %v301_v4  ;;  %v307_v15 = vpack.c.bf16 %v112_v9, %v111_v8  ;;  %v114_v18 = vld [vmem:[%s500_s3 + $0x38] sm:$0xff]  ;;  %v115_v23 = vld [vmem:[%s500_s3 + $0x40] sm:$0xff]  ;;  %v116_v24 = vld [vmem:[%s500_s3 + $0x48] sm:$0xff]  ;;  %297 = vmatprep.mubr.msk.f32.mxu0 %vm355_vm0, %v356_v27  ;;  %s358_s15 = smov 120   ;;  %vm55_vm1 = vcmask 1031168   ;;  %vm69_vm2 = vcmask 1014784  }
  0x13   :  { %303 = vmatprep.subr.bf16.mxu0 %v352_v0  ;;  %v310_v21 = vpack.c.bf16 %v114_v18, %v113_v17  ;;  %v313_v28 = vpack.c.bf16 %v116_v24, %v115_v23  ;;  %v117_v30 = vld [vmem:[%s500_s3 + $0x50] sm:$0xff]  ;;  %v118_v31 = vld [vmem:[%s500_s3 + $0x58] sm:$0xff]  ;;  %v119_v34 = vld [vmem:[%s500_s3 + $0x60] sm:$0xff]  ;;  %vm83_vm3 = vcmask 998400   ;;  %vm97_vm4 = vcmask 982016  }
  0x14   :  { %v316_v33 = vpack.c.bf16 %v118_v31, %v117_v30  ;;  %v120_v35 = vld [vmem:[%s500_s3 + $0x68] sm:$0xff]  ;;  %v121_v37 = vld [vmem:[%s500_s3 + $0x70] sm:$0xff]  ;;  %v122_v38 = vld [vmem:[%s500_s3 + $0x78] sm:$0xff]  ;;  %v359_v62 = vmov 1   ;;  %v360_v63 = vmov 0   ;;  %vm233_vm7 = vcmask 31744  }
  0x15   :  { %v60_v11 = vstv %s241_s29  ;;  %v46_v13 = vstv %s240_s30  ;;  %s354_s29 = smov 126   ;;  %v319_v36 = vpack.c.bf16 %v120_v35, %v119_v34  ;;  %v322_v39 = vpack.c.bf16 %v122_v38, %v121_v37  ;;  %335 = vset.pattern.permute.xlu1 %v359_v62  ;;  %334 = vset.pattern.permute.xlu0 %v360_v63 }
  0x16   :  { %v61_v12 = vmul.f32 %v60_v11, %v422_v6  ;;  %v47_v14 = vmul.f32 %v46_v13, %v422_v6  ;;  %305 = vmatpush3.bf16.msra.mxu0 %v304_v7  ;;  %v62_v16 = vmul.f32 %v60_v11, %v41_v10  ;;  %v48_v19 = vmul.f32 %v46_v13, %v41_v10  ;;  %v245_v7 = vld [vmem:[%s502_s5] ss:$0 sm:$0xff] }
  0x17   :  { %306 = vmatprep.subr.bf16.mxu0 %v352_v0  ;;  %v74_v20 = vstv %s414_s13  ;;  %v88_v26 = vstv %s434_s24  ;;  %s42_s24 = sld [smem:[#allocation3]] }
  0x18   :  { %65 = vrot.lane.b32.xlu1 %v61_v12, %s353_s25  ;;  %51 = vrot.lane.b32.xlu0 %v47_v14, %s354_s29  ;;  %v76_v22 = vmul.f32 %v74_v20, %v41_v10  ;;  %v75_v25 = vmul.f32 %v74_v20, %v422_v6  ;;  %v90_v29 = vmul.f32 %v88_v26, %v41_v10  ;;  %v247_v12 = vld [vmem:[%s503_s6] ss:$0 sm:$0xff] }
  0x19   :  { %v89_v32 = vmul.f32 %v88_v26, %v422_v6 }
  0x1a   :  { %308 = vmatpush3.bf16.msra.mxu0 %v307_v15 }
  0x1b   :  { %309 = vmatprep.subr.bf16.mxu0 %v352_v0 }
  0x1c   :  { %67 = vrot.lane.b32.xlu1 %v62_v16, %s353_s25  ;;  %53 = vrot.lane.b32.xlu0 %v48_v19, %s354_s29 }
  0x1d   :  { %v43_v41 = vstv %s42_s24 }
  0x1e   :  { %311 = vmatpush3.bf16.msra.mxu0 %v310_v21  ;;  %v44_v43 = vmul.f32 %v43_v41, %v422_v6  ;;  %v246_v6 = vld [vmem:[%s502_s5 + $0x1] ss:$0 sm:$0xff] }
  0x1f   :  { %312 = vmatprep.subr.bf16.mxu0 %v352_v0 }
  0x20   :  { %81 = vrot.lane.b32.xlu1 %v76_v22, %s357_s10  ;;  %79 = vrot.lane.b32.xlu0 %v75_v25, %s357_s10 }
  0x22   :  { %314 = vmatpush3.bf16.msra.mxu0 %v313_v28 }
  0x23   :  { %315 = vmatprep.subr.bf16.mxu0 %v352_v0 }
  0x24   :  { %95 = vrot.lane.b32.xlu1 %v90_v29, %s358_s15  ;;  %93 = vrot.lane.b32.xlu0 %v89_v32, %s358_s15 }
  0x26   :  { %317 = vmatpush3.bf16.msra.mxu0 %v316_v33 }
  0x27   :  { %318 = vmatprep.subr.bf16.mxu0 %v352_v0 }
  0x2a   :  { %320 = vmatpush3.bf16.msra.mxu0 %v319_v36 }
  0x2b   :  { %321 = vmatprep.subr.bf16.mxu0 %v352_v0  ;;  %v244_v0 = vld [vmem:[%s501_s4] ss:$0 sm:$0xff] }
  0x2e   :  { %323 = vmatpush3.bf16.msra.mxu0 %v322_v39 }
  0x8a   :  { %v66_v40 = vpop.permute.xlu1 %65  ;;  %v52_v42 = vpop.permute.xlu0 %51 }
  0x8e   :  { %v68_v44 = vpop.permute.xlu1 %67  ;;  %v54_v45 = vpop.permute.xlu0 %53 }
  0x8f   :  { %v56_v46 = vsel %vm55_vm1, %v52_v42, %v54_v45  ;;  %v70_v48 = vsel %vm69_vm2, %v66_v40, %v68_v44 }
  0x90   :  { %v58_v47 = vadd.f32 %v56_v46, %v44_v43 }
  0x92   :  { %v82_v49 = vpop.permute.xlu1 %81  ;;  %v80_v50 = vpop.permute.xlu0 %79  ;;  %v72_v51 = vadd.f32 %v70_v48, %v58_v47 }
  0x93   :  { %v84_v52 = vsel %vm83_vm3, %v80_v50, %v82_v49 }
  0x94   :  { %v86_v54 = vadd.f32 %v84_v52, %v72_v51 }
  0x96   :  { %v96_v53 = vpop.permute.xlu1 %95  ;;  %v94_v55 = vpop.permute.xlu0 %93 }
  0x97   :  { %v98_v57 = vsel %vm97_vm4, %v94_v55, %v96_v53 }
  0x98   :  { %v100_v58 = vadd.f32 %v98_v57, %v86_v54 }
  0x9a   :  { %v103_v59 = vadd.f32 %v102_v56, %v100_v58 }
  0x9c   :  { %vm104_vm5 = vcmp.gt.f32.partialorder %v103_v59, 0.0  ;;  %v105_v60 = vmul.f32 0.01, %v103_v59 }
  0x9e   :  { %v106_v61 = vsel %vm104_vm5, %v103_v59, %v105_v60 }
  0x9f   :  { %298 = vmatmul.mubr.f32.vlgmr.msra.gmra.mrb[0].mxu0 %v106_v61 }
 0x172   :  { %v196_v1 = vpop.f32.mrb[0].mxu0 }
 0x173   :  { %v197_v2 = vadd.f32 %v244_v0, %v196_v1  ;;  %v299_v3 = vpop.f32.mrb[1].mxu0 }
 0x175   :  { %v201_v4 = vmul.f32 0.01, %v197_v2  ;;  %vm200_vm6 = vcmp.gt.f32.partialorder %v197_v2, 0.0 }
 0x177   :  { %v202_v5 = vsel %vm200_vm6, %v197_v2, %v201_v4 }
 0x178   :  { %216 = vperm.xlu1 %335, %v202_v5   ;;  %206 = vperm.xlu0 %334, %v202_v5  }
 0x17c   :  { %336 = vset.pattern.permute.xlu0 %v359_v62 }
 0x1f7   :  { %v217_v8 = vpop.permute.xlu1 %216  ;;  %v207_v9 = vpop.permute.xlu0 %206 }
 0x1f8   :  { %v223_v10 = vmul.f32 %v246_v6, %v217_v8  ;;  %v213_v11 = vmul.f32 %v245_v7, %v207_v9 }
 0x1fa   :  { %v224_v13 = vadd.f32 %v223_v10, %v213_v11 }
 0x1fc   :  { %v232_v14 = vadd.f32 %v247_v12, %v224_v13 }
 0x1fe   :  { %234 = vst.msk [vmem:[%s504_s7] sm:$0xff] %vm233_vm7, %v232_v14 }
 0x1ff   :  { %239 = vsyncpa [#allocation4], 1 }

</bundles_post_ra>
